<compile_context>
chip_gen: v7x
topology: tpu7x:2x2x1
jax: 0.10.0
libtpu: 0.0.40
codegen_flags: <defaults>
</compile_context>

<pallas_src>
import functools

import jax
import jax.numpy as jnp
from jax.experimental import pallas as pl
from jax.experimental.pallas import tpu as pltpu

WINDOW_SIZE = 1024               # torchcrepe.WINDOW_SIZE
CREPE_SAMPLE_RATE = 16000        # torchcrepe.SAMPLE_RATE
PITCH_BINS = 360                 # torchcrepe.PITCH_BINS
BN_EPS = 0.0010000000474974513   # torchcrepe BatchNorm2d eps
LANE = 128


def _round_up(x, m):
    return (x + m - 1) // m * m


# ----------------------------------------------------------------------------
# Pallas kernels
# ----------------------------------------------------------------------------
def _frame_norm_kernel(x_ref, o_ref, *, L):
    """Frame(zmean=True) + x / clip(x.std(unbiased), min=1e-10), row-tiled."""
    x = x_ref[...]                                           # (tile, L) f32
    m = jnp.mean(x, axis=-1, keepdims=True)
    z = x - m                                                # zmean (Frame)
    var = jnp.sum(z * z, axis=-1, keepdims=True) / (L - 1)   # torch unbiased std
    std = jnp.sqrt(var)
    o_ref[...] = (z / jnp.maximum(std, 1e-10)).astype(o_ref.dtype)


def _conv_pool_kernel(act_ref, w_ref, bst_ref, o_ref, acc_ref, pad_ref, *,
                      G, C_in, H_in, H_out, pad_l):
    """One tap-chunk of a direct stride-1 conv, height-major (H, bn, C) layout.

    Grid = (bn_tiles, cout_tiles, n_chunks); the chunk axis is "arbitrary" and
    streams (G*C_in, cout_tile) weight blocks via BlockSpec.  The activation
    (+ zero halo + zero channel padding) is staged once per (bn, cout) tile
    into a VMEM buffer; tap slices are leading-dim slices (no relayout).
    Epilogue fuses conv bias, ReLU, eval-mode BatchNorm affine and
    MaxPool2d((2,1),(2,1)); only the pooled bf16 activation is written to HBM.
    """
    k = pl.program_id(2)
    bn = act_ref.shape[1]
    c_act = act_ref.shape[2]

    @pl.when(k == 0)
    def _():
        # halo (pad_l/pad_r rows) and channel padding never touch HBM
        pad_ref[...] = jnp.zeros(pad_ref.shape, pad_ref.dtype)
        pad_ref[pad_l:pad_l + H_in, :, 0:c_act] = act_ref[...]

    # G tap slices folded into the lane dim -> MXU contraction depth G*C_in
    k0 = pl.multiple_of(k * G, G)
    if G == 1:
        cols = pad_ref[pl.ds(k0, H_out), :, :]
    else:
        cols = jnp.concatenate(
            [pad_ref[pl.ds(k0 + g, H_out), :, :] for g in range(G)], axis=-1)
    a2 = cols.reshape(H_out * bn, G * C_in)
    part = jnp.dot(a2, w_ref[...], preferred_element_type=jnp.float32)

    @pl.when(k == 0)
    def _():
        acc_ref[...] = part

    @pl.when(k != 0)
    def _():
        acc_ref[...] += part

    @pl.when(k == pl.num_programs(2) - 1)
    def _():
        z = acc_ref[...] + bst_ref[0:1, :]            # conv bias
        z = jnp.maximum(z, 0.0)                       # ReLU
        z = z * bst_ref[1:2, :] + bst_ref[2:3, :]     # folded eval-mode BatchNorm
        c = z.shape[-1]
        z = z.reshape(H_out // 2, 2, bn, c).max(axis=1)   # MaxPool2d((2,1))
        o_ref[...] = z.astype(o_ref.dtype)


def _dense_sigmoid_kernel(a_ref, w_ref, b_ref, o_ref):
    """Classifier: Linear + sigmoid (lane-dense, N padded to 384)."""
    z = jnp.dot(a_ref[...], w_ref[...], preferred_element_type=jnp.float32)
    o_ref[...] = jax.nn.sigmoid(z + b_ref[...]).astype(o_ref.dtype)


# ----------------------------------------------------------------------------
# Pallas wrappers
# ----------------------------------------------------------------------------
def frame_normalize(frames, out_dtype=jnp.bfloat16):
    BN, L = frames.shape
    tile = min(512, _round_up(BN, 8))        # HBM-bound: big row tiles
    BNp = _round_up(BN, tile)
    if BNp != BN:
        frames = jnp.pad(frames, ((0, BNp - BN), (0, 0)))
    out = pl.pallas_call(
        functools.partial(_frame_norm_kernel, L=L),
        out_shape=jax.ShapeDtypeStruct((BNp, L), out_dtype),
        grid_spec=pltpu.PrefetchScalarGridSpec(
            num_scalar_prefetch=0,
            grid=(BNp // tile,),
            in_specs=[pl.BlockSpec((tile, L), lambda i: (i, 0))],
            out_specs=pl.BlockSpec((tile, L), lambda i: (i, 0)),
        ),
        compiler_params=pltpu.CompilerParams(dimension_semantics=("parallel",)),
    )(frames)
    return out[:BN] if BNp != BN else out


def conv_block(act, layer, bn_tile):
    """act: (H_in, BNp, C_act) bf16 height-major.  Returns (H_pool, BNp, C_out_pad)."""
    H_in, BNp, C_act = act.shape
    assert BNp % bn_tile == 0
    C_in = layer["C_in_pad"]
    pad_l, pad_r = layer["pad"]
    H_pad = H_in + pad_l + pad_r
    K, G = layer["K"], layer["G"]
    H_out = H_pad - K + 1
    assert H_out % 2 == 0, "MaxPool2d((2,1)) epilogue requires even H_out"
    H_pool = H_out // 2
    C_out_pad = layer["w"].shape[1]
    n_chunks = K // G
    cout_tile = 128   # full MXU lane width everywhere; small weight/acc VMEM

    kernel = functools.partial(_conv_pool_kernel, G=G, C_in=C_in,
                               H_in=H_in, H_out=H_out, pad_l=pad_l)
    return pl.pallas_call(
        kernel,
        out_shape=jax.ShapeDtypeStruct((H_pool, BNp, C_out_pad), jnp.bfloat16),
        grid_spec=pltpu.PrefetchScalarGridSpec(
            num_scalar_prefetch=0,
            grid=(BNp // bn_tile, C_out_pad // cout_tile, n_chunks),
            in_specs=[
                # unpadded activation: only re-DMAed when the bn tile changes
                pl.BlockSpec((H_in, bn_tile, C_act), lambda i, j, k: (0, i, 0)),
                # weight tap-chunk streamed along the "arbitrary" axis
                pl.BlockSpec((G * C_in, cout_tile), lambda i, j, k: (k, j)),
                pl.BlockSpec((3, cout_tile), lambda i, j, k: (0, j)),
            ],
            out_specs=pl.BlockSpec((H_pool, bn_tile, cout_tile),
                                   lambda i, j, k: (0, i, j)),
            scratch_shapes=[
                pltpu.VMEM((H_out * bn_tile, cout_tile), jnp.float32),   # acc
                pltpu.VMEM((H_pad, bn_tile, C_in), jnp.bfloat16),        # halo stage
            ]),
        compiler_params=pltpu.CompilerParams(
            dimension_semantics=("parallel", "parallel", "arbitrary"),
            vmem_limit_bytes=32 * 1024 * 1024),
    )(act, layer["w"], layer["bst"])


def dense_sigmoid(a, w, b):
    M, Kd = a.shape
    _, N = w.shape
    tm = min(256, _round_up(M, 8))
    Mp = _round_up(M, tm)
    if Mp != M:
        a = jnp.pad(a, ((0, Mp - M), (0, 0)))
    out = pl.pallas_call(
        _dense_sigmoid_kernel,
        out_shape=jax.ShapeDtypeStruct((Mp, N), jnp.float32),
        grid_spec=pltpu.PrefetchScalarGridSpec(
            num_scalar_prefetch=0,
            grid=(Mp // tm,),
            in_specs=[
                pl.BlockSpec((tm, Kd), lambda i: (i, 0)),
                pl.BlockSpec((Kd, N), lambda i: (0, 0)),
                pl.BlockSpec((1, N), lambda i: (0, 0)),
            ],
            out_specs=pl.BlockSpec((tm, N), lambda i: (i, 0)),
        ),
        compiler_params=pltpu.CompilerParams(dimension_semantics=("parallel",)),
    )(a, w, b.reshape(1, N))
    return out[:M] if Mp != M else out


# ----------------------------------------------------------------------------
# JAX glue (framing only; layer-1 fold/transpose are cheap small-tensor ops)
# ----------------------------------------------------------------------------
def frame_signal(x, frame_length, frame_period):
    """diffsptk Frame (center=True) without zmean (zmean fused into Pallas norm)."""
    left = frame_length // 2
    right = (frame_length - 1) // 2
    xp = jnp.pad(x, ((0, 0), (left, right)))
    n_frames = (xp.shape[-1] - frame_length) // frame_period + 1
    idx = jnp.arange(n_frames)[:, None] * frame_period + jnp.arange(frame_length)[None, :]
    return xp[:, idx]                                        # (B, N, L)


# ----------------------------------------------------------------------------
# Synthetic CREPE parameters (deterministic) — pre-folded / padded for TPU
# ----------------------------------------------------------------------------
def init_crepe_params(key, model="tiny"):
    if model == "full":
        in_ch = [1, 1024, 128, 128, 128, 256]
        out_ch = [1024, 128, 128, 128, 256, 512]
        in_features = 2048
    elif model == "tiny":
        in_ch = [1, 128, 16, 16, 16, 32]
        out_ch = [128, 16, 16, 16, 32, 64]
        in_features = 256
    else:
        raise ValueError("model must be 'tiny' or 'full'.")
    kernels = [512] + [64] * 5
    strides = [4] + [1] * 5
    pads = [(254, 254)] + [(31, 32)] * 5

    layers = []
    for i in range(6):
        key, kw, kb, kg, kbe, km, kv = jax.random.split(key, 7)
        K, Cin, Cout = kernels[i], in_ch[i], out_ch[i]
        fan_in = Cin * K
        # logical conv weight (K, C_in, C_out); == torch (C_out,C_in,K,1) permuted
        w = jax.random.normal(kw, (K, Cin, Cout), jnp.float32) / jnp.sqrt(fan_in)
        b = 0.01 * jax.random.normal(kb, (Cout,), jnp.float32)
        gamma = 1.0 + 0.1 * jax.random.normal(kg, (Cout,), jnp.float32)
        beta = 0.01 * jax.random.normal(kbe, (Cout,), jnp.float32)
        run_mean = 0.1 * jax.random.normal(km, (Cout,), jnp.float32)
        run_var = 1.0 + 0.1 * jax.random.uniform(kv, (Cout,), jnp.float32)
        scale = gamma / jnp.sqrt(run_var + BN_EPS)           # eval-mode BN folded
        shift = beta - run_mean * scale

        if i == 0:
            # fold stride 4 into channels: stride-4 conv (K=512, C=1) becomes a
            # stride-1 conv (K=128, C=4).  w[t, r, co] = w_orig[4t + r, co].
            K_eff, C_eff = K // strides[0], Cin * strides[0]
            w = w.reshape(K_eff, C_eff, Cout)
            C_in_pad = 16                                    # pad 4->16 in-kernel
            conv_pad = (0, 0)                                # raw-signal pad in fwd
        else:
            K_eff, C_eff = K, Cin
            C_in_pad = _round_up(C_eff, LANE)                # = prev C_out_pad
            conv_pad = pads[i]
        C_out_pad = _round_up(Cout, LANE)

        w_p = jnp.zeros((K_eff, C_in_pad, C_out_pad), jnp.float32)
        w_p = w_p.at[:, :C_eff, :Cout].set(w)
        bst = jnp.zeros((3, C_out_pad), jnp.float32)         # [bias; scale; shift]
        bst = bst.at[0, :Cout].set(b)
        bst = bst.at[1, :Cout].set(scale)
        bst = bst.at[1, Cout:].set(1.0)                      # pad channels -> 0 out
        bst = bst.at[2, :Cout].set(shift)

        # tap-chunk size: MXU contraction G*C_in_pad targets 256-512
        # (256-deep MXU on v6e/v7x, >=128 keeps the v5e MXU full)
        G = max(1, min(16, 512 // C_in_pad))
        while K_eff % G:
            G -= 1

        layers.append(dict(
            w=w_p.reshape(K_eff * C_in_pad, C_out_pad).astype(jnp.bfloat16),
            bst=bst, K=K_eff, G=G, C_in_pad=C_in_pad, c_out=Cout,
            pad=conv_pad, raw_pad=pads[0] if i == 0 else None,
            fold=strides[0] if i == 0 else 1))

    key, kcw, kcb = jax.random.split(key, 3)
    cw = jax.random.normal(kcw, (in_features, PITCH_BINS), jnp.float32) / jnp.sqrt(in_features)
    cb = 0.01 * jax.random.normal(kcb, (PITCH_BINS,), jnp.float32)
    n_pad = _round_up(PITCH_BINS, LANE)                      # 360 -> 384 (lane dense)
    cw_p = jnp.zeros((in_features, n_pad), jnp.float32).at[:, :PITCH_BINS].set(cw)
    cb_p = jnp.zeros((n_pad,), jnp.float32).at[:PITCH_BINS].set(cb)
    return layers, (cw_p.astype(jnp.bfloat16), cb_p)


# ----------------------------------------------------------------------------
# Forward pass (== PitchExtractionByCREPE.forward)
# ----------------------------------------------------------------------------
def crepe_forward(x, layers, classifier, frame_period, sample_rate, embed=True):
    # torchaudio Resample(sample_rate -> 16000): identity when sample_rate == 16000.
    # TODO(synk): general polyphase resampling (sample_rate != 16000) not implemented.
    assert sample_rate == CREPE_SAMPLE_RATE
    hop = frame_period * CREPE_SAMPLE_RATE // sample_rate

    frames = frame_signal(x.astype(jnp.float32), WINDOW_SIZE, hop)   # (B, N, 1024)
    B, Nf, L = frames.shape
    BN = B * Nf
    frames = frame_normalize(frames.reshape(BN, L))          # Pallas: zmean+unit-std, bf16

    # small bn tiles keep >=2 "parallel" grid steps when possible (v7x: 2 TCs)
    bn_tile = 8 if BN < 64 else 16
    BNp = _round_up(BN, bn_tile)

    # layer-1 prep: raw-window conv pad + batch pad in ONE XLA pad, fold stride 4
    # into channels (free view), transpose to the height-major (H, BN, C) layout.
    # The 4->16 channel pad happens inside the conv kernel (never hits HBM).
    # TODO(synk): emit this layout directly from the frame_normalize kernel.
    p0 = layers[0]
    pad_l, pad_r = p0["raw_pad"]
    x1 = jnp.pad(frames, ((0, BNp - BN), (pad_l, pad_r)))    # (BNp, 1532)
    x1 = x1.reshape(BNp, (L + pad_l + pad_r) // p0["fold"], p0["fold"])
    x1 = jnp.transpose(x1, (1, 0, 2))                        # (383, BNp, 4)

    # TODO(synk): for the tiny model, layers 2-5(-6) could be fused into one
    # VMEM-resident Pallas kernel (weights + per-tile acts fit easily).
    act = conv_block(x1, p0, bn_tile)                        # (128, BNp, 128)
    for p in layers[1:5]:
        act = conv_block(act, p, bn_tile)                    # -> (8, BNp, 128)

    if embed:
        emb = act[:, :BN, :layers[4]["c_out"]]               # (8, BN, 32): drop padding
        # torchcrepe embed tensor is (BN, C, H, 1); flatten order is c*H + h
        return jnp.transpose(emb, (1, 2, 0)).reshape(B, Nf, -1).astype(jnp.float32)

    act = conv_block(act, layers[5], bn_tile)                # (4, BNp, 128)
    # torchcrepe: permute(0,2,1,3).reshape -> flatten order h*C + c
    flat = jnp.transpose(act[:, :, :layers[5]["c_out"]], (1, 0, 2)).reshape(BNp, -1)
    cw, cb = classifier
    prob = dense_sigmoid(flat, cw, cb)                       # (BNp, 384) f32
    return prob[:BN, :PITCH_BINS].reshape(B, Nf, PITCH_BINS)


# ----------------------------------------------------------------------------
if __name__ == "__main__":
    key = jax.random.PRNGKey(0)
    kx, kp = jax.random.split(key)

    # Module config: frame_period=256, sample_rate=16000 (resample identity), model='tiny'
    B, T = 2, 1024
    frame_period, sample_rate = 256, 16000
    x = jax.random.normal(kx, (B, T), jnp.float32)

    layers, classifier = init_crepe_params(kp, model="tiny")

    emb = crepe_forward(x, layers, classifier, frame_period, sample_rate, embed=True)
    prob = crepe_forward(x, layers, classifier, frame_period, sample_rate, embed=False)
    jax.block_until_ready(emb)
    jax.block_until_ready(prob)

    # (B, N, D) with N = (T-1)//hop + 1 = 4; tiny embed D = 32*8 = 256; prob C = 360
    assert emb.shape == (2, 4, 256), emb.shape
    assert prob.shape == (2, 4, 360), prob.shape
    assert bool(jnp.all(jnp.isfinite(emb))) and bool(jnp.all(jnp.isfinite(prob)))
    print("KERNEL_OK")
</pallas_src>

<mosaic_0001>
module attributes {stable_mosaic.version = 11 : i64} {
  func.func @_frame_norm_kernel(%arg0: i32, %arg1: memref<8x1024xf32, #tpu.memory_space<vmem>>, %arg2: memref<8x1024xbf16, #tpu.memory_space<vmem>>) attributes {dimension_semantics = [#tpu.dimension_semantics<parallel>], iteration_bounds = array<i64: 1>, scalar_prefetch = 0 : i64, scratch_operands = 0 : i64, tpu.core_type = #tpu.core_type<tc>, window_params = [{transform_indices = @transform_0, window_bounds = array<i64: 8, 1024>}, {transform_indices = @transform_1, window_bounds = array<i64: 8, 1024>}]} {
    %c0 = arith.constant 0 : index
    %c0_0 = arith.constant 0 : index
    %0 = vector.load %arg1[%c0, %c0_0] : memref<8x1024xf32, #tpu.memory_space<vmem>>, vector<8x1024xf32>
    %cst = arith.constant dense<0.000000e+00> : vector<8xf32>
    %1 = vector.multi_reduction <add>, %0, %cst [1] : vector<8x1024xf32> to vector<8xf32>
    %2 = vector.shape_cast %1 : vector<8xf32> to vector<8x1xf32>
    %cst_1 = arith.constant 1.024000e+03 : f32
    %3 = vector.broadcast %cst_1 : f32 to vector<8x1xf32>
    %4 = arith.divf %2, %3 : vector<8x1xf32>
    %5 = vector.broadcast %4 : vector<8x1xf32> to vector<8x1024xf32>
    %6 = arith.subf %0, %5 : vector<8x1024xf32>
    %7 = arith.mulf %6, %6 : vector<8x1024xf32>
    %cst_2 = arith.constant dense<0.000000e+00> : vector<8xf32>
    %8 = vector.multi_reduction <add>, %7, %cst_2 [1] : vector<8x1024xf32> to vector<8xf32>
    %9 = vector.shape_cast %8 : vector<8xf32> to vector<8x1xf32>
    %cst_3 = arith.constant 1.023000e+03 : f32
    %10 = vector.broadcast %cst_3 : f32 to vector<8x1xf32>
    %11 = arith.divf %9, %10 : vector<8x1xf32>
    %12 = math.sqrt %11 : vector<8x1xf32>
    %cst_4 = arith.constant 1.000000e-10 : f32
    %13 = vector.broadcast %cst_4 : f32 to vector<8x1xf32>
    %14 = arith.maximumf %12, %13 : vector<8x1xf32>
    %15 = vector.broadcast %14 : vector<8x1xf32> to vector<8x1024xf32>
    %16 = arith.divf %6, %15 : vector<8x1024xf32>
    %17 = arith.truncf %16 : vector<8x1024xf32> to vector<8x1024xbf16>
    %c0_5 = arith.constant 0 : index
    %c0_6 = arith.constant 0 : index
    %18 = vector.load %arg2[%c0_5, %c0_6] : memref<8x1024xbf16, #tpu.memory_space<vmem>>, vector<8x1024xbf16>
    tpu.vector_store %arg2[%c0_5, %c0_6], %17 {strides = array<i32>} : memref<8x1024xbf16, #tpu.memory_space<vmem>>, vector<8x1024xbf16>,
    return
  }
  func.func @transform_0(%arg0: i32) -> (i32, i32) {
    %c0_i32 = arith.constant 0 : i32
    %c0_i32_0 = arith.constant 0 : i32
    return %arg0, %c0_i32 : i32, i32
  }
  func.func @transform_1(%arg0: i32) -> (i32, i32) {
    %c0_i32 = arith.constant 0 : i32
    %c0_i32_0 = arith.constant 0 : i32
    return %arg0, %c0_i32 : i32, i32
  }
}

</mosaic_0001>

<bundles_post_ra>
// kernel: tpu_custom_call.1
= control target key start
LH: loop header
LB: loop body
LE: loop exit
PB: predicated region body
PF: predicated region fallthrough
CT: control target
= control target key end

     0   :  { %6 = vsyncpa [#allocation3], 0  ;;  %s233_s0 = inlined_call_operand.hbm [shape: f32[8,1024], index: 0, kind: input, shape index: {}]   ;;  %s234_s1 = inlined_call_operand.hbm [shape: bf16[8,1024], index: 1, kind: output, shape index: {}]  }
   0x1   :  { %7 = vsyncpa [#allocation4], 0  ;;  %s197_s6 = smov [#allocation2]   ;;  %s149_s10 = scalar_lea.hbm %s233_s0, 1024 }
   0x2   :  { %s14_s7 = sshll.u32 %s197_s6, 4  ;;  %p150_p0 = scmp.ne.s32.totalorder %s233_s0, %s149_s10  ;;  %s15_s7 = int_to_ptr.vmem [resolvable:$true] %s14_s7 }
   0x3   :  { %p153_p1 = scmp.lt.u32.totalorder %s149_s10, %s233_s0 }
   0x5   :  { %p155_p2 = pnand %p153_p1, %p150_p0 }
   0x7   :  { %158 = shalt.err (!%p155_p2)
}
   0x8   :  { %s159_s15 = scalar_lea.vmem %s15_s7, 1024  ;;  %p164_p4 = scmp.lt.s32.totalorder %s15_s7, %s15_s7 }
   0x9   :  { %p160_p3 = scmp.ne.s32.totalorder %s15_s7, %s159_s15  ;;  %p165_p5 = scmp.lt.s32.totalorder %s159_s15, %s159_s15 }
   0xb   :  { %p166_p6 = por %p165_p5, %p164_p4 }
   0xd   :  { %p167_p7 = pnand %p166_p6, %p160_p3 }
   0xf   :  { %170 = shalt.err (!%p167_p7)
}
  0x10   :  { %17 = dma.hbm_to_vmem [thread:$0]  %s233_s0, 1024, %s15_s7, [#allocation3]  }
  0x11   :  { %193 = dma.done.wait [#allocation3], 1024  }
  0x12   :  { %194 = vsyncadd [#allocation3], 4294966272  ;;  %v21_v0 = vld [vmem:[#allocation2] sm:$0xff]  ;;  %v22_v1 = vld [vmem:[#allocation2 + $0x8] sm:$0xff]  ;;  %s198_s0 = smov [#allocation5]  }
  0x13   :  { %v23_v2 = vld [vmem:[#allocation2 + $0x10] sm:$0xff]  ;;  %v29_v3 = vadd.f32 %v22_v1, %v21_v0  ;;  %v24_v4 = vld [vmem:[#allocation2 + $0x18] sm:$0xff]  ;;  %v25_v6 = vld [vmem:[#allocation2 + $0x20] sm:$0xff]  ;;  %s126_s18 = sshll.u32 %s198_s0, 4  ;;  %s127_s18 = int_to_ptr.vmem [resolvable:$true] %s126_s18 }
  0x14   :  { %v26_v8 = vld [vmem:[#allocation2 + $0x28] sm:$0xff]  ;;  %v27_v10 = vld [vmem:[#allocation2 + $0x30] sm:$0xff]  ;;  %v28_v12 = vld [vmem:[#allocation2 + $0x38] sm:$0xff]  ;;  %s171_s19 = scalar_lea.vmem %s127_s18, 512  ;;  %p176_p9 = scmp.lt.s32.totalorder %s127_s18, %s127_s18 }
  0x15   :  { %v30_v5 = vadd.f32 %v29_v3, %v23_v2  ;;  %p172_p8 = scmp.ne.s32.totalorder %s127_s18, %s171_s19  ;;  %p177_p10 = scmp.lt.s32.totalorder %s171_s19, %s171_s19 }
  0x17   :  { %v31_v7 = vadd.f32 %v30_v5, %v24_v4  ;;  %p178_p11 = por %p177_p10, %p176_p9 }
  0x19   :  { %v32_v9 = vadd.f32 %v31_v7, %v25_v6  ;;  %p179_p12 = pnand %p178_p11, %p172_p8 }
  0x1b   :  { %v33_v11 = vadd.f32 %v32_v9, %v26_v8 }
  0x1d   :  { %v34_v13 = vadd.f32 %v33_v11, %v27_v10 }
  0x1f   :  { %v35_v14 = vadd.f32 %v34_v13, %v28_v12 }
  0x21   :  { %36 = vadd.xlane.f32.xlu0 %v35_v14 }
  0xae   :  { %v37_v15 = vpop.xlane.xlu0 %36 }
  0xaf   :  { %v39_v16 = vmul.f32 0.0009765625, %v37_v15 }
  0xb1   :  { %v40_v17 = vsub.f32 %v21_v0, %v39_v16  ;;  %v41_v18 = vsub.f32 %v22_v1, %v39_v16  ;;  %v42_v19 = vsub.f32 %v23_v2, %v39_v16  ;;  %v43_v20 = vsub.f32 %v24_v4, %v39_v16 }
  0xb2   :  { %v44_v23 = vsub.f32 %v25_v6, %v39_v16  ;;  %v45_v26 = vsub.f32 %v26_v8, %v39_v16  ;;  %v46_v29 = vsub.f32 %v27_v10, %v39_v16  ;;  %v47_v32 = vsub.f32 %v28_v12, %v39_v16 }
  0xb3   :  { %v48_v21 = vmul.f32 %v40_v17, %v40_v17  ;;  %v49_v22 = vmul.f32 %v41_v18, %v41_v18  ;;  %v50_v24 = vmul.f32 %v42_v19, %v42_v19  ;;  %v51_v27 = vmul.f32 %v43_v20, %v43_v20 }
  0xb4   :  { %v52_v30 = vmul.f32 %v44_v23, %v44_v23  ;;  %v53_v33 = vmul.f32 %v45_v26, %v45_v26  ;;  %v54_v35 = vmul.f32 %v46_v29, %v46_v29  ;;  %v55_v37 = vmul.f32 %v47_v32, %v47_v32 }
  0xb5   :  { %v56_v25 = vadd.f32 %v49_v22, %v48_v21 }
  0xb7   :  { %v57_v28 = vadd.f32 %v56_v25, %v50_v24 }
  0xb9   :  { %v58_v31 = vadd.f32 %v57_v28, %v51_v27 }
  0xbb   :  { %v59_v34 = vadd.f32 %v58_v31, %v52_v30 }
  0xbd   :  { %v60_v36 = vadd.f32 %v59_v34, %v53_v33 }
  0xbf   :  { %v61_v38 = vadd.f32 %v60_v36, %v54_v35 }
  0xc1   :  { %v62_v39 = vadd.f32 %v61_v38, %v55_v37 }
  0xc3   :  { %63 = vadd.xlane.f32.xlu0 %v62_v39 }
 0x150   :  { %v64_v40 = vpop.xlane.xlu0 %63 }
 0x151   :  { %v66_v41 = vmul.f32 0.0009775171, %v64_v40 }
 0x153   :  { %145 = vrsqrt.f32 %v66_v41  ;;  %vm69_vm0 = vcmp.eq.f32.partialorder %v66_v41, inf  ;;  %v72_v44 = vand.u32 2147483648, %v66_v41  ;;  %vm71_vm1 = vcmp.eq.f32.partialorder %v66_v41, 0.0 }
 0x15d   :  { %v146_v42 = vpop.eup %145 }
 0x15e   :  { %v68_v43 = vmul.f32 %v146_v42, %v66_v41 }
 0x160   :  { %v70_v45 = vsel %vm69_vm0, %v66_v41, %v68_v43 }
 0x161   :  { %v73_v46 = vsel %vm71_vm1, %v72_v44, %v70_v45 }
 0x162   :  { %v74_v47 = vmax.f32 %v73_v46, 1e-10 }
 0x164   :  { %147 = vrcp.f32 %v74_v47 }
 0x16e   :  { %v148_v48 = vpop.eup %147 }
 0x16f   :  { %v76_v49 = vmul.f32 %v148_v48, %v40_v17  ;;  %v77_v50 = vmul.f32 %v148_v48, %v41_v18  ;;  %v78_v51 = vmul.f32 %v148_v48, %v42_v19  ;;  %v79_v52 = vmul.f32 %v148_v48, %v43_v20 }
 0x170   :  { %v80_v53 = vmul.f32 %v148_v48, %v44_v23  ;;  %v81_v54 = vmul.f32 %v148_v48, %v45_v26  ;;  %v82_v55 = vmul.f32 %v148_v48, %v46_v29  ;;  %v83_v56 = vmul.f32 %v148_v48, %v47_v32 }
 0x171   :  { %v139_v57 = vpack.c.bf16 %v77_v50, %v76_v49  ;;  %v140_v58 = vpack.c.bf16 %v79_v52, %v78_v51 }
 0x172   :  { %v141_v59 = vpack.c.bf16 %v81_v54, %v80_v53  ;;  %v142_v60 = vpack.c.bf16 %v83_v56, %v82_v55 }
 0x173   :  { %116 = vst [vmem:[#allocation5] sm:$0xff] %v139_v57  ;;  %117 = vst [vmem:[#allocation5 + $0x8] sm:$0xff] %v140_v58 }
 0x174   :  { %118 = vst [vmem:[#allocation5 + $0x10] sm:$0xff] %v141_v59  ;;  %119 = vst [vmem:[#allocation5 + $0x18] sm:$0xff] %v142_v60 }
 0x175   :  { %182 = shalt.err (!%p179_p12)
}
 0x176   :  { %s183_s22 = scalar_lea.hbm %s234_s1, 512 }
 0x177   :  { %p184_p13 = scmp.ne.s32.totalorder %s234_s1, %s183_s22  ;;  %p187_p0 = scmp.lt.u32.totalorder %s183_s22, %s234_s1 }
 0x179   :  { %p189_p1 = pnand %p187_p0, %p184_p13 }
 0x17b   :  { %192 = shalt.err (!%p189_p1)
}
 0x17c   :  { %129 = dma.vmem_to_hbm [thread:$0]  %s127_s18, 512, %s234_s1, [#allocation4]  }
 0x17d   :  { %195 = dma.done.wait [#allocation4], 512  }
 0x17e   :  { %196 = vsyncadd [#allocation4], 4294966784 }
 0x17f   :  { %133 = vsyncpa [#allocation3], 1 }
 0x180   :  { %134 = vsyncpa [#allocation4], 1 }

</bundles_post_ra>
